<compile_context>
chip_gen: v6e
topology: v6e:2x2x1
jax: 0.10.0
libtpu: 0.0.40
codegen_flags: <defaults>
</compile_context>

<pallas_src>
import functools

import jax
import jax.numpy as jnp
from jax.experimental import pallas as pl
from jax.experimental.pallas import tpu as pltpu


def _embedding_kernel(x_ref, w_ref, shift_ref, o_ref):
    # x_ref:     (bb, C_in,  tile_m) VMEM   (bb = batch elements per block)
    # w_ref:     (C_out, C_in)       VMEM   (BN scale already folded in)
    # shift_ref: (C_out, 1)          VMEM   (folded BN shift)
    # o_ref:     (bb, C_out, tile_m) VMEM   (lane-dense output tile)
    w = w_ref[...]
    shift = shift_ref[...]
    # bb is static and tiny (1 for large inputs, N for tiny ones) -> unrolled.
    for b in range(x_ref.shape[0]):
        # Single MXU matmul per batch element; f32 accumulation on the MXU,
        # only +shift / ReLU / cast stay on the VPU.
        acc = jnp.dot(w, x_ref[b], preferred_element_type=jnp.float32)
        o_ref[b] = jnp.maximum(acc + shift, 0.0).astype(o_ref.dtype)


@functools.partial(jax.jit, static_argnames=("eps", "max_tile_m"))
def embedding_forward(x_nchw, weight, gamma, beta, running_mean, running_var,
                      eps=1e-5, *, max_tile_m=16384):
    """Forward pass of Embedding (1x1 conv -> BN(eval) -> ReLU).

    x_nchw: (N, C_in, H, W); weight: (C_out, C_in) = 1x1 conv weight squeezed.
    """
    n, c_in, h, w = x_nchw.shape
    c_out = weight.shape[0]
    hw = h * w

    # Fold eval-mode BN into the conv weight (scale) and a per-channel shift.
    scale = gamma / jnp.sqrt(running_var + eps)                    # (C_out,)
    shift = (beta - running_mean * scale).reshape(c_out, 1)        # (C_out, 1)
    shift = shift.astype(jnp.float32)
    w_scaled = (weight * scale[:, None]).astype(jnp.float32)       # (C_out, C_in)

    # Pure view: NCHW -> (N, C_in, H*W).  Lane-pad H*W to a 128 multiple only
    # if needed so every output store is unmasked (lane-dense).  Padded lanes
    # are computed (relu(shift)) and sliced off afterwards; the contraction is
    # only over C_in so valid outputs cannot be corrupted.
    x3 = x_nchw.reshape(n, c_in, hw)
    hw_pad = ((hw + 127) // 128) * 128
    if hw_pad != hw:
        x3 = jnp.pad(x3, ((0, 0), (0, 0), (0, hw_pad - hw)))

    # M tile: as large as possible (multiple of 128), up to max_tile_m.  The
    # blocks are only (C_in + C_out) rows tall, so even 16384 double-buffered
    # is ~5 MiB of VMEM -- fine on every generation (do NOT shrink for v7x).
    tile_m = min(hw_pad, max_tile_m)
    grid_m = pl.cdiv(hw_pad, tile_m)

    # Tiny problems: keep the whole batch in one block (single grid step)
    # instead of paying the fixed per-step cost per batch element.
    total_bytes = 4 * n * hw_pad * (c_in + c_out)
    bb = n if total_bytes <= (2 << 20) else 1
    grid_b = n // bb

    out3 = pl.pallas_call(
        _embedding_kernel,
        out_shape=jax.ShapeDtypeStruct((n, c_out, hw_pad), x_nchw.dtype),
        grid_spec=pltpu.PrefetchScalarGridSpec(
            num_scalar_prefetch=0,
            grid=(grid_b, grid_m),
            in_specs=[
                pl.BlockSpec((bb, c_in, tile_m), lambda i, j: (i, 0, j)),
                pl.BlockSpec((c_out, c_in), lambda i, j: (0, 0)),
                pl.BlockSpec((c_out, 1), lambda i, j: (0, 0)),
            ],
            out_specs=pl.BlockSpec((bb, c_out, tile_m), lambda i, j: (i, 0, j)),
        ),
        compiler_params=pltpu.CompilerParams(
            dimension_semantics=("parallel", "parallel")),
        cost_estimate=pl.CostEstimate(
            flops=2 * n * hw_pad * c_in * c_out,
            transcendentals=0,
            bytes_accessed=4 * (n * hw_pad * (c_in + c_out)
                                + c_out * (c_in + 1))),
    )(x3, w_scaled, shift)

    if hw_pad != hw:
        out3 = out3[:, :, :hw]
    # (N, C_out, H*W) -> NCHW, a pure view.
    return out3.reshape(n, c_out, h, w)


def _reference(x_nchw, weight, gamma, beta, running_mean, running_var, eps=1e-5):
    # Pure-JAX reference.  The 1x1 conv is done as an exact f32
    # broadcast-multiply-sum over the tiny C_in axis (no matmul), so the
    # reference itself has no TPU matmul-precision ambiguity.
    y = jnp.sum(x_nchw[:, None, :, :, :] * weight[None, :, :, None, None],
                axis=2)                                   # (N, C_out, H, W)
    scale = gamma / jnp.sqrt(running_var + eps)
    shift = beta - running_mean * scale
    y = y * scale[None, :, None, None] + shift[None, :, None, None]
    return jnp.maximum(y, 0.0)


if __name__ == "__main__":
    key = jax.random.PRNGKey(0)
    k_x, k_w, k_g, k_b, k_m, k_v, k_x2 = jax.random.split(key, 7)

    # Small shapes implied by the module: NCHW features.
    N, C_IN, H, W = 2, 4, 16, 16
    C_OUT = 32

    x = jax.random.normal(k_x, (N, C_IN, H, W), dtype=jnp.float32)

    # Deterministic kaiming_normal_(mode='fan_out') init for the 1x1 conv:
    # std = sqrt(2 / fan_out) = sqrt(2 / C_OUT) since the kernel is 1x1.
    std = (2.0 / C_OUT) ** 0.5
    weight = std * jax.random.normal(k_w, (C_OUT, C_IN), dtype=jnp.float32)

    # Mildly non-trivial BN params / running stats so the folded scale+shift
    # path is actually exercised (fresh init would make the fold a no-op).
    gamma = 1.0 + 0.05 * jax.random.normal(k_g, (C_OUT,), jnp.float32)
    beta = 0.05 * jax.random.normal(k_b, (C_OUT,), jnp.float32)
    running_mean = 0.1 * jax.random.normal(k_m, (C_OUT,), jnp.float32)
    running_var = 1.0 + 0.1 * jax.random.uniform(k_v, (C_OUT,), jnp.float32)

    out = embedding_forward(x, weight, gamma, beta, running_mean, running_var)
    out = jax.block_until_ready(out)
    ref = _reference(x, weight, gamma, beta, running_mean, running_var)
    assert out.shape == (N, C_OUT, H, W), out.shape
    # Tolerance allows for the MXU's internal pass decomposition of the f32
    # contraction; real layout/fold bugs produce O(0.1+) errors.
    assert jnp.allclose(out, ref, atol=2e-2, rtol=2e-2), "mismatch vs reference"

    # Also exercise the lane-pad path (H*W = 196, not a multiple of 128).
    x2 = jax.random.normal(k_x2, (N, C_IN, 14, 14), dtype=jnp.float32)
    out2 = jax.block_until_ready(
        embedding_forward(x2, weight, gamma, beta, running_mean, running_var))
    ref2 = _reference(x2, weight, gamma, beta, running_mean, running_var)
    assert out2.shape == (N, C_OUT, 14, 14), out2.shape
    assert jnp.allclose(out2, ref2, atol=2e-2, rtol=2e-2), "mismatch (pad path)"

    print("KERNEL_OK")
</pallas_src>

<mosaic_0001>
module attributes {stable_mosaic.version = 11 : i64} {
  func.func @_embedding_kernel(%arg0: i32, %arg1: i32, %arg2: memref<2x4x256xf32, #tpu.memory_space<vmem>>, %arg3: memref<32x4xf32, #tpu.memory_space<vmem>>, %arg4: memref<32x1xf32, #tpu.memory_space<vmem>>, %arg5: memref<2x32x256xf32, #tpu.memory_space<vmem>>) attributes {dimension_semantics = [#tpu.dimension_semantics<parallel>, #tpu.dimension_semantics<parallel>], iteration_bounds = array<i64: 1, 1>, scalar_prefetch = 0 : i64, scratch_operands = 0 : i64, tpu.core_type = #tpu.core_type<tc>, window_params = [{transform_indices = @transform_0, window_bounds = array<i64: 2, 4, 256>}, {pipeline_mode = #tpu.pipeline_mode<synchronous>, transform_indices = @transform_1, window_bounds = array<i64: 32, 4>}, {pipeline_mode = #tpu.pipeline_mode<synchronous>, transform_indices = @transform_2, window_bounds = array<i64: 32, 1>}, {transform_indices = @transform_3, window_bounds = array<i64: 2, 32, 256>}]} {
    %c0 = arith.constant 0 : index
    %c0_0 = arith.constant 0 : index
    %0 = vector.load %arg3[%c0, %c0_0] : memref<32x4xf32, #tpu.memory_space<vmem>>, vector<32x4xf32>
    %c0_1 = arith.constant 0 : index
    %c0_2 = arith.constant 0 : index
    %1 = vector.load %arg4[%c0_1, %c0_2] : memref<32x1xf32, #tpu.memory_space<vmem>>, vector<32x1xf32>
    %c0_3 = arith.constant 0 : index
    %c0_4 = arith.constant 0 : index
    %c0_5 = arith.constant 0 : index
    %2 = vector.load %arg2[%c0_3, %c0_4, %c0_5] : memref<2x4x256xf32, #tpu.memory_space<vmem>>, vector<1x4x256xf32>
    %3 = vector.shape_cast %2 : vector<1x4x256xf32> to vector<4x256xf32>
    %cst = arith.constant dense<0.000000e+00> : vector<32x256xf32>
    %4 = tpu.matmul %0, %3, %cst {dimension_numbers = #tpu.dot_dimension_numbers<[1], [0], [0], [1], [0, 0, 1, 1], [], []>} : vector<32x4xf32>, vector<4x256xf32>, vector<32x256xf32> -> vector<32x256xf32>
    %5 = vector.broadcast %1 : vector<32x1xf32> to vector<32x256xf32>
    %6 = arith.addf %4, %5 : vector<32x256xf32>
    %cst_6 = arith.constant 0.000000e+00 : f32
    %7 = vector.broadcast %cst_6 : f32 to vector<32x256xf32>
    %8 = arith.maximumf %6, %7 : vector<32x256xf32>
    %c0_7 = arith.constant 0 : index
    %c0_8 = arith.constant 0 : index
    %c0_9 = arith.constant 0 : index
    %9 = vector.load %arg5[%c0_7, %c0_8, %c0_9] : memref<2x32x256xf32, #tpu.memory_space<vmem>>, vector<1x32x256xf32>
    %10 = vector.shape_cast %9 : vector<1x32x256xf32> to vector<32x256xf32>
    %11 = vector.shape_cast %8 : vector<32x256xf32> to vector<1x32x256xf32>
    tpu.vector_store %arg5[%c0_7, %c0_8, %c0_9], %11 {strides = array<i32>} : memref<2x32x256xf32, #tpu.memory_space<vmem>>, vector<1x32x256xf32>,
    %c1 = arith.constant 1 : index
    %c0_10 = arith.constant 0 : index
    %c0_11 = arith.constant 0 : index
    %12 = vector.load %arg2[%c1, %c0_10, %c0_11] : memref<2x4x256xf32, #tpu.memory_space<vmem>>, vector<1x4x256xf32>
    %13 = vector.shape_cast %12 : vector<1x4x256xf32> to vector<4x256xf32>
    %cst_12 = arith.constant dense<0.000000e+00> : vector<32x256xf32>
    %14 = tpu.matmul %0, %13, %cst_12 {dimension_numbers = #tpu.dot_dimension_numbers<[1], [0], [0], [1], [0, 0, 1, 1], [], []>} : vector<32x4xf32>, vector<4x256xf32>, vector<32x256xf32> -> vector<32x256xf32>
    %15 = vector.broadcast %1 : vector<32x1xf32> to vector<32x256xf32>
    %16 = arith.addf %14, %15 : vector<32x256xf32>
    %cst_13 = arith.constant 0.000000e+00 : f32
    %17 = vector.broadcast %cst_13 : f32 to vector<32x256xf32>
    %18 = arith.maximumf %16, %17 : vector<32x256xf32>
    %c1_14 = arith.constant 1 : index
    %c0_15 = arith.constant 0 : index
    %c0_16 = arith.constant 0 : index
    %19 = vector.load %arg5[%c1_14, %c0_15, %c0_16] : memref<2x32x256xf32, #tpu.memory_space<vmem>>, vector<1x32x256xf32>
    %20 = vector.shape_cast %19 : vector<1x32x256xf32> to vector<32x256xf32>
    %21 = vector.shape_cast %18 : vector<32x256xf32> to vector<1x32x256xf32>
    tpu.vector_store %arg5[%c1_14, %c0_15, %c0_16], %21 {strides = array<i32>} : memref<2x32x256xf32, #tpu.memory_space<vmem>>, vector<1x32x256xf32>,
    return
  }
  func.func @transform_0(%arg0: i32, %arg1: i32) -> (i32, i32, i32) {
    %c0_i32 = arith.constant 0 : i32
    %c0_i32_0 = arith.constant 0 : i32
    return %arg0, %c0_i32, %arg1 : i32, i32, i32
  }
  func.func @transform_1(%arg0: i32, %arg1: i32) -> (i32, i32) {
    %c0_i32 = arith.constant 0 : i32
    %c0_i32_0 = arith.constant 0 : i32
    %c0_i32_1 = arith.constant 0 : i32
    return %c0_i32, %c0_i32_0 : i32, i32
  }
  func.func @transform_2(%arg0: i32, %arg1: i32) -> (i32, i32) {
    %c0_i32 = arith.constant 0 : i32
    %c0_i32_0 = arith.constant 0 : i32
    %c0_i32_1 = arith.constant 0 : i32
    return %c0_i32, %c0_i32_0 : i32, i32
  }
  func.func @transform_3(%arg0: i32, %arg1: i32) -> (i32, i32, i32) {
    %c0_i32 = arith.constant 0 : i32
    %c0_i32_0 = arith.constant 0 : i32
    return %arg0, %c0_i32, %arg1 : i32, i32, i32
  }
}

</mosaic_0001>

<bundles_post_ra>
// kernel: embedding_forward.1
= control target key start
LH: loop header
LB: loop body
LE: loop exit
PB: predicated region body
PF: predicated region fallthrough
CT: control target
= control target key end

     0   :  { %vm58_vm0 = vcmask 1043456   ;;  %v313_v2 = vmov 0.0   ;;  %v314_v5 = vmov 0   ;;  %vm45_vm1 = vcmask 31744   ;;  %s425_s0 = inlined_call_operand.vmem [shape: f32[2,4,256], index: 0, kind: input, shape index: {}]   ;;  %s426_s1 = inlined_call_operand.vmem [shape: f32[32,4], index: 1, kind: input, shape index: {}]   ;;  %s427_s2 = inlined_call_operand.vmem [shape: f32[32,1], index: 2, kind: input, shape index: {}]   ;;  %s428_s3 = inlined_call_operand.vmem [shape: f32[2,32,256], index: 3, kind: output, shape index: {}]  }
   0x1   :  { %v22_v0 = vld [vmem:[%s425_s0] sm:$0xff]  ;;  %v292_v1 = vld [vmem:[%s425_s0 + $0x8] sm:$0xff]  ;;  %127 = vmatprep.mubr.f32.mxu0 %v313_v2  ;;  %240 = vmatprep.mubr.f32.mxu1 %v313_v2  ;;  %v20_v8 = vld [vmem:[%s427_s2 + $0x10] sm:$0xff] }
   0x2   :  { %v44_v3 = vcombine.high %v22_v0, %v22_v0  ;;  %v171_v4 = vcombine.high %v292_v1, %v292_v1  ;;  %309 = vset.pattern.permute.xlu0 %v314_v5  ;;  %310 = vset.pattern.permute.xlu1 %v314_v5  ;;  %v14_v6 = vld [vmem:[%s426_s1] sm:$0xff]  ;;  %v15_v9 = vld [vmem:[%s426_s1 + $0x8] sm:$0xff]  ;;  %v21_v11 = vld [vmem:[%s427_s2 + $0x18] sm:$0xff] }
   0x3   :  { %v18_v7 = vld [vmem:[%s427_s2] sm:$0xff]  ;;  %35 = vperm.xlu1 %310, %v20_v8   ;;  %v19_v10 = vld [vmem:[%s427_s2 + $0x8] sm:$0xff]  ;;  %v16_v12 = vld [vmem:[%s426_s1 + $0x10] sm:$0xff] }
   0x4   :  { %286 = vmatprep.subr.msk.mxu0 %vm58_vm0, %v44_v3  ;;  %293 = vmatprep.subr.msk.mxu1 %vm58_vm0, %v171_v4  ;;  %v17_v13 = vld [vmem:[%s426_s1 + $0x18] sm:$0xff] }
   0x5   :  { %287 = vmatpush1.msk.msra.mxu0 %vm58_vm0, %v22_v0  ;;  %294 = vmatpush1.msk.msra.mxu1 %vm58_vm0, %v292_v1 }
   0x6   :  { %288 = vmatmul.mubr.msk.f32.vlgmr.msra.gmra.mxu0 %vm45_vm1, %v14_v6  ;;  %295 = vmatmul.mubr.msk.f32.vlgmr.msra.gmra.mxu1 %vm45_vm1, %v14_v6 }
   0x7   :  { %133 = vmatprep.mubr.f32.mxu0 %v313_v2  ;;  %246 = vmatprep.mubr.f32.mxu1 %v313_v2 }
   0x8   :  { %25 = vperm.xlu0 %309, %v18_v7   ;;  %40 = vperm.xlu1 %310, %v21_v11  }
   0xa   :  { %289 = vmatmul.mubr.msk.f32.gmra.mxu0 %vm45_vm1, %v15_v9  ;;  %296 = vmatmul.mubr.msk.f32.gmra.mxu1 %vm45_vm1, %v15_v9 }
   0xb   :  { %139 = vmatprep.mubr.f32.mxu0 %v313_v2  ;;  %252 = vmatprep.mubr.f32.mxu1 %v313_v2 }
   0xc   :  { %30 = vperm.xlu0 %309, %v19_v10  }
   0xe   :  { %290 = vmatmul.mubr.msk.f32.gmra.mxu0 %vm45_vm1, %v16_v12  ;;  %297 = vmatmul.mubr.msk.f32.gmra.mxu1 %vm45_vm1, %v16_v12 }
   0xf   :  { %145 = vmatprep.mubr.f32.mxu0 %v313_v2  ;;  %258 = vmatprep.mubr.f32.mxu1 %v313_v2 }
  0x12   :  { %291 = vmatmul.mubr.msk.f32.gmra.mxu0 %vm45_vm1, %v17_v13  ;;  %298 = vmatmul.mubr.msk.f32.gmra.mxu1 %vm45_vm1, %v17_v13 }
  0x7e   :  { %v36_v32 = vpop.permute.xlu1 %35 }
  0x83   :  { %v26_v14 = vpop.permute.xlu0 %25  ;;  %v41_v49 = vpop.permute.xlu1 %40 }
  0x87   :  { %v31_v19 = vpop.permute.xlu0 %30 }
  0xc6   :  { %v129_v15 = vpop.f32.mrf.mxu0  ;;  %v242_v16 = vpop.f32.mrf.mxu1 }
  0xc7   :  { %v130_v17 = vadd.f32 %v129_v15, %v26_v14  ;;  %v243_v18 = vadd.f32 %v242_v16, %v26_v14 }
  0xc8   :  { %v131_v20 = vpop.f32.mrf.mxu0  ;;  %v244_v21 = vpop.f32.mrf.mxu1 }
  0xc9   :  { %v152_v22 = vmax.f32 %v130_v17, 0.0  ;;  %v265_v23 = vmax.f32 %v243_v18, 0.0  ;;  %v132_v24 = vadd.f32 %v131_v20, %v26_v14  ;;  %v245_v25 = vadd.f32 %v244_v21, %v26_v14 }
  0xca   :  { %v135_v26 = vpop.f32.mrf.mxu0  ;;  %v248_v27 = vpop.f32.mrf.mxu1 }
  0xcb   :  { %160 = vst [vmem:[%s428_s3] sm:$0xff] %v152_v22  ;;  %299 = vst [vmem:[%s428_s3 + $0x40] sm:$0xff] %v265_v23  ;;  %v153_v28 = vmax.f32 %v132_v24, 0.0  ;;  %v266_v29 = vmax.f32 %v245_v25, 0.0  ;;  %v136_v30 = vadd.f32 %v135_v26, %v31_v19  ;;  %v249_v31 = vadd.f32 %v248_v27, %v31_v19 }
  0xcc   :  { %v137_v33 = vpop.f32.mrf.mxu0  ;;  %v250_v34 = vpop.f32.mrf.mxu1 }
  0xcd   :  { %161 = vst [vmem:[%s428_s3 + $0x8] sm:$0xff] %v153_v28  ;;  %300 = vst [vmem:[%s428_s3 + $0x48] sm:$0xff] %v266_v29  ;;  %v154_v35 = vmax.f32 %v136_v30, 0.0  ;;  %v267_v36 = vmax.f32 %v249_v31, 0.0  ;;  %v138_v37 = vadd.f32 %v137_v33, %v31_v19  ;;  %v251_v38 = vadd.f32 %v250_v34, %v31_v19 }
  0xce   :  { %v141_v39 = vpop.f32.mrf.mxu0  ;;  %v254_v40 = vpop.f32.mrf.mxu1 }
  0xcf   :  { %162 = vst [vmem:[%s428_s3 + $0x10] sm:$0xff] %v154_v35  ;;  %301 = vst [vmem:[%s428_s3 + $0x50] sm:$0xff] %v267_v36  ;;  %v155_v41 = vmax.f32 %v138_v37, 0.0  ;;  %v268_v42 = vmax.f32 %v251_v38, 0.0  ;;  %v142_v43 = vadd.f32 %v141_v39, %v36_v32  ;;  %v255_v44 = vadd.f32 %v254_v40, %v36_v32 }
  0xd0   :  { %v143_v45 = vpop.f32.mrf.mxu0  ;;  %v256_v46 = vpop.f32.mrf.mxu1 }
  0xd1   :  { %163 = vst [vmem:[%s428_s3 + $0x18] sm:$0xff] %v155_v41  ;;  %302 = vst [vmem:[%s428_s3 + $0x58] sm:$0xff] %v268_v42  ;;  %v156_v47 = vmax.f32 %v142_v43, 0.0  ;;  %v269_v48 = vmax.f32 %v255_v44, 0.0  ;;  %v144_v50 = vadd.f32 %v143_v45, %v36_v32  ;;  %v257_v51 = vadd.f32 %v256_v46, %v36_v32 }
  0xd2   :  { %v147_v52 = vpop.f32.mrf.mxu0  ;;  %v260_v53 = vpop.f32.mrf.mxu1 }
  0xd3   :  { %164 = vst [vmem:[%s428_s3 + $0x20] sm:$0xff] %v156_v47  ;;  %303 = vst [vmem:[%s428_s3 + $0x60] sm:$0xff] %v269_v48  ;;  %v157_v54 = vmax.f32 %v144_v50, 0.0  ;;  %v270_v55 = vmax.f32 %v257_v51, 0.0  ;;  %v148_v56 = vadd.f32 %v147_v52, %v41_v49  ;;  %v261_v57 = vadd.f32 %v260_v53, %v41_v49 }
  0xd4   :  { %v149_v58 = vpop.f32.mrf.mxu0  ;;  %v262_v59 = vpop.f32.mrf.mxu1 }
  0xd5   :  { %165 = vst [vmem:[%s428_s3 + $0x28] sm:$0xff] %v157_v54  ;;  %304 = vst [vmem:[%s428_s3 + $0x68] sm:$0xff] %v270_v55  ;;  %v158_v60 = vmax.f32 %v148_v56, 0.0  ;;  %v271_v61 = vmax.f32 %v261_v57, 0.0  ;;  %v150_v62 = vadd.f32 %v149_v58, %v41_v49  ;;  %v263_v63 = vadd.f32 %v262_v59, %v41_v49 }
  0xd7   :  { %166 = vst [vmem:[%s428_s3 + $0x30] sm:$0xff] %v158_v60  ;;  %305 = vst [vmem:[%s428_s3 + $0x70] sm:$0xff] %v271_v61  ;;  %v159_v0 = vmax.f32 %v150_v62, 0.0  ;;  %v272_v1 = vmax.f32 %v263_v63, 0.0 }
  0xd9   :  { %167 = vst [vmem:[%s428_s3 + $0x38] sm:$0xff] %v159_v0  ;;  %306 = vst [vmem:[%s428_s3 + $0x78] sm:$0xff] %v272_v1 }

</bundles_post_ra>
